<compile_context>
chip_gen: v6e
topology: v6e:2x2x1
jax: 0.10.0
libtpu: 0.0.40
codegen_flags: <defaults>
</compile_context>

<pallas_src>
import jax
import jax.numpy as jnp
from jax.experimental import pallas as pl
from jax.experimental.pallas import tpu as pltpu


def _round_up(x, m):
    return (x + m - 1) // m * m


def _mlp_kernel(xT_ref, w1_ref, b1_ref, w2_ref, b2_ref, out_ref):
    # xT_ref : (obs, TB)   -- batch tile on the lane axis (lane-dense load)
    # w1_ref : (Hp, obs)   -- PyTorch (out, in) layout, hidden padded to mult. of 8
    # b1_ref : (Hp, 1)
    # w2_ref : (Ap, Hp)
    # b2_ref : (Ap, 1)
    # out_ref: (Ap, TB)    -- lane-dense store
    h = jnp.dot(w1_ref[...], xT_ref[...], preferred_element_type=jnp.float32)
    h = jnp.maximum(h + b1_ref[...], 0.0)                      # bias + ReLU (VPU)
    o = jnp.dot(w2_ref[...], h, preferred_element_type=jnp.float32)
    out_ref[...] = (o + b2_ref[...]).astype(out_ref.dtype)


def prepare_params(w1, b1, w2, b2):
    """Pad PyTorch-layout params once so the kernel never relayouts per call.

    w1: (hidden, obs), b1: (hidden,), w2: (n_actions, hidden), b2: (n_actions,)
    Padded hidden units have zero weight and zero bias (ReLU(0) = 0); padded
    action rows are exactly zero and get sliced off in the wrapper.
    """
    hidden, obs = w1.shape
    n_actions = w2.shape[0]
    hp = _round_up(hidden, 8)
    ap = _round_up(n_actions, 8)
    w1p = jnp.zeros((hp, obs), jnp.float32).at[:hidden, :].set(w1)
    b1p = jnp.zeros((hp, 1), jnp.float32).at[:hidden, 0].set(b1)
    w2p = jnp.zeros((ap, hp), jnp.float32).at[:n_actions, :hidden].set(w2)
    b2p = jnp.zeros((ap, 1), jnp.float32).at[:n_actions, 0].set(b2)
    return w1p, b1p, w2p, b2p


def net_forward_lane_major(xT, w1p, b1p, w2p, b2p, n_actions, *, block_b=256):
    """Core kernel call.

    xT: (obs, B) lane-major observations (whole CEM population fused).
    Returns logits in lane-major layout: (n_actions, B).
    """
    assert block_b % 128 == 0, "batch tile must be a multiple of 128 lanes"
    obs, batch = xT.shape
    hp = w1p.shape[0]
    ap = w2p.shape[0]

    tb = min(block_b, _round_up(batch, 128))
    bp = _round_up(batch, tb)
    if bp != batch:
        xT = jnp.pad(xT, ((0, 0), (0, bp - batch)))

    out = pl.pallas_call(
        _mlp_kernel,
        out_shape=jax.ShapeDtypeStruct((ap, bp), jnp.float32),
        grid=(bp // tb,),
        in_specs=[
            pl.BlockSpec((obs, tb), lambda i: (0, i)),    # x tile: pipelined
            pl.BlockSpec((hp, obs), lambda i: (0, 0)),    # weights pinned in VMEM
            pl.BlockSpec((hp, 1), lambda i: (0, 0)),
            pl.BlockSpec((ap, hp), lambda i: (0, 0)),
            pl.BlockSpec((ap, 1), lambda i: (0, 0)),
        ],
        out_specs=pl.BlockSpec((ap, tb), lambda i: (0, i)),
        compiler_params=pltpu.CompilerParams(
            dimension_semantics=("parallel",),            # v7x: 2 TCs share batch
        ),
    )(xT, w1p, b1p, w2p, b2p)
    return out[:n_actions, :batch]


def net_forward(x, w1, b1, w2, b2, *, block_b=256):
    """PyTorch-compatible forward: x (B, obs) -> logits (B, n_actions).

    The transposes here are wrapper-side layout plumbing; a real CEM driver
    should keep observations lane-major (obs, B) and call
    net_forward_lane_major directly with pre-prepared (padded) parameters.
    """
    n_actions = w2.shape[0]
    w1p, b1p, w2p, b2p = prepare_params(w1, b1, w2, b2)
    out_lm = net_forward_lane_major(
        x.T, w1p, b1p, w2p, b2p, n_actions, block_b=block_b
    )
    return out_lm.T


def init_params(key, obs_size, hidden_size, n_actions):
    """Deterministic PyTorch-Linear-like init, in PyTorch (out, in) layout."""
    k1, k2, k3, k4 = jax.random.split(key, 4)
    lim1 = 1.0 / jnp.sqrt(obs_size)
    lim2 = 1.0 / jnp.sqrt(hidden_size)
    w1 = jax.random.uniform(k1, (hidden_size, obs_size), jnp.float32, -lim1, lim1)
    b1 = jax.random.uniform(k2, (hidden_size,), jnp.float32, -lim1, lim1)
    w2 = jax.random.uniform(k3, (n_actions, hidden_size), jnp.float32, -lim2, lim2)
    b2 = jax.random.uniform(k4, (n_actions,), jnp.float32, -lim2, lim2)
    return w1, b1, w2, b2


if __name__ == "__main__":
    # CartPole-like Net sizes; the batch is the entire CEM population x
    # timesteps fused into one kernel call (the point of the redesign).
    obs_size, hidden_size, n_actions = 4, 32, 2
    batch = 1024

    key = jax.random.PRNGKey(0)
    kx, kp = jax.random.split(key)
    x = jax.random.normal(kx, (batch, obs_size), jnp.float32)
    w1, b1, w2, b2 = init_params(kp, obs_size, hidden_size, n_actions)

    fwd = jax.jit(net_forward)
    out = jax.block_until_ready(fwd(x, w1, b1, w2, b2))

    # Reference: same math as the PyTorch module (raw logits, no softmax).
    ref = jnp.maximum(x @ w1.T + b1, 0.0) @ w2.T + b2
    assert out.shape == (batch, n_actions)
    assert jnp.allclose(out, ref, atol=1e-4, rtol=1e-4)

    print("KERNEL_OK")
</pallas_src>

<mosaic_0001>
module attributes {stable_mosaic.version = 11 : i64} {
  func.func @_mlp_kernel(%arg0: i32, %arg1: memref<4x256xf32, #tpu.memory_space<vmem>>, %arg2: memref<32x4xf32, #tpu.memory_space<vmem>>, %arg3: memref<32x1xf32, #tpu.memory_space<vmem>>, %arg4: memref<8x32xf32, #tpu.memory_space<vmem>>, %arg5: memref<8x1xf32, #tpu.memory_space<vmem>>, %arg6: memref<8x256xf32, #tpu.memory_space<vmem>>) attributes {dimension_semantics = [#tpu.dimension_semantics<parallel>], iteration_bounds = array<i64: 4>, scalar_prefetch = 0 : i64, scratch_operands = 0 : i64, tpu.core_type = #tpu.core_type<tc>, window_params = [{transform_indices = @transform_0, window_bounds = array<i64: 4, 256>}, {pipeline_mode = #tpu.pipeline_mode<synchronous>, transform_indices = @transform_1, window_bounds = array<i64: 32, 4>}, {pipeline_mode = #tpu.pipeline_mode<synchronous>, transform_indices = @transform_2, window_bounds = array<i64: 32, 1>}, {pipeline_mode = #tpu.pipeline_mode<synchronous>, transform_indices = @transform_3, window_bounds = array<i64: 8, 32>}, {pipeline_mode = #tpu.pipeline_mode<synchronous>, transform_indices = @transform_4, window_bounds = array<i64: 8, 1>}, {transform_indices = @transform_5, window_bounds = array<i64: 8, 256>}]} {
    %c0 = arith.constant 0 : index
    %c0_0 = arith.constant 0 : index
    %0 = vector.load %arg2[%c0, %c0_0] : memref<32x4xf32, #tpu.memory_space<vmem>>, vector<32x4xf32>
    %c0_1 = arith.constant 0 : index
    %c0_2 = arith.constant 0 : index
    %1 = vector.load %arg1[%c0_1, %c0_2] : memref<4x256xf32, #tpu.memory_space<vmem>>, vector<4x256xf32>
    %cst = arith.constant dense<0.000000e+00> : vector<32x256xf32>
    %2 = tpu.matmul %0, %1, %cst {dimension_numbers = #tpu.dot_dimension_numbers<[1], [0], [0], [1], [0, 0, 1, 1], [], []>} : vector<32x4xf32>, vector<4x256xf32>, vector<32x256xf32> -> vector<32x256xf32>
    %c0_3 = arith.constant 0 : index
    %c0_4 = arith.constant 0 : index
    %3 = vector.load %arg3[%c0_3, %c0_4] : memref<32x1xf32, #tpu.memory_space<vmem>>, vector<32x1xf32>
    %4 = vector.broadcast %3 : vector<32x1xf32> to vector<32x256xf32>
    %5 = arith.addf %2, %4 : vector<32x256xf32>
    %cst_5 = arith.constant 0.000000e+00 : f32
    %6 = vector.broadcast %cst_5 : f32 to vector<32x256xf32>
    %7 = arith.maximumf %5, %6 : vector<32x256xf32>
    %c0_6 = arith.constant 0 : index
    %c0_7 = arith.constant 0 : index
    %8 = vector.load %arg4[%c0_6, %c0_7] : memref<8x32xf32, #tpu.memory_space<vmem>>, vector<8x32xf32>
    %cst_8 = arith.constant dense<0.000000e+00> : vector<8x256xf32>
    %9 = tpu.matmul %8, %7, %cst_8 {dimension_numbers = #tpu.dot_dimension_numbers<[1], [0], [0], [1], [0, 0, 1, 1], [], []>} : vector<8x32xf32>, vector<32x256xf32>, vector<8x256xf32> -> vector<8x256xf32>
    %c0_9 = arith.constant 0 : index
    %c0_10 = arith.constant 0 : index
    %10 = vector.load %arg5[%c0_9, %c0_10] : memref<8x1xf32, #tpu.memory_space<vmem>>, vector<8x1xf32>
    %11 = vector.broadcast %10 : vector<8x1xf32> to vector<8x256xf32>
    %12 = arith.addf %9, %11 : vector<8x256xf32>
    %c0_11 = arith.constant 0 : index
    %c0_12 = arith.constant 0 : index
    %13 = vector.load %arg6[%c0_11, %c0_12] : memref<8x256xf32, #tpu.memory_space<vmem>>, vector<8x256xf32>
    tpu.vector_store %arg6[%c0_11, %c0_12], %12 {strides = array<i32>} : memref<8x256xf32, #tpu.memory_space<vmem>>, vector<8x256xf32>,
    return
  }
  func.func @transform_0(%arg0: i32) -> (i32, i32) {
    %c0_i32 = arith.constant 0 : i32
    %c0_i32_0 = arith.constant 0 : i32
    return %c0_i32, %arg0 : i32, i32
  }
  func.func @transform_1(%arg0: i32) -> (i32, i32) {
    %c0_i32 = arith.constant 0 : i32
    %c0_i32_0 = arith.constant 0 : i32
    %c0_i32_1 = arith.constant 0 : i32
    return %c0_i32, %c0_i32_0 : i32, i32
  }
  func.func @transform_2(%arg0: i32) -> (i32, i32) {
    %c0_i32 = arith.constant 0 : i32
    %c0_i32_0 = arith.constant 0 : i32
    %c0_i32_1 = arith.constant 0 : i32
    return %c0_i32, %c0_i32_0 : i32, i32
  }
  func.func @transform_3(%arg0: i32) -> (i32, i32) {
    %c0_i32 = arith.constant 0 : i32
    %c0_i32_0 = arith.constant 0 : i32
    %c0_i32_1 = arith.constant 0 : i32
    return %c0_i32, %c0_i32_0 : i32, i32
  }
  func.func @transform_4(%arg0: i32) -> (i32, i32) {
    %c0_i32 = arith.constant 0 : i32
    %c0_i32_0 = arith.constant 0 : i32
    %c0_i32_1 = arith.constant 0 : i32
    return %c0_i32, %c0_i32_0 : i32, i32
  }
  func.func @transform_5(%arg0: i32) -> (i32, i32) {
    %c0_i32 = arith.constant 0 : i32
    %c0_i32_0 = arith.constant 0 : i32
    return %c0_i32, %arg0 : i32, i32
  }
}

</mosaic_0001>

<bundles_post_ra>
// kernel: net_forward.1
= control target key start
LH: loop header
LB: loop body
LE: loop exit
PB: predicated region body
PF: predicated region fallthrough
CT: control target
= control target key end

     0   :  { %s585_s18 = smov 0   ;;  %s636_s0 = inlined_call_operand.vmem [shape: f32[4,1024], index: 0, kind: input, shape index: {}]   ;;  %s637_s1 = inlined_call_operand.vmem [shape: f32[32,4], index: 1, kind: input, shape index: {}]   ;;  %s638_s2 = inlined_call_operand.vmem [shape: f32[32,1], index: 2, kind: input, shape index: {}]   ;;  %s639_s3 = inlined_call_operand.vmem [shape: f32[8,32], index: 3, kind: input, shape index: {}]   ;;  %s640_s4 = inlined_call_operand.vmem [shape: f32[8,1], index: 4, kind: input, shape index: {}]   ;;  %s641_s5 = inlined_call_operand.vmem [shape: f32[8,1024], index: 5, kind: output, shape index: {}]  }
   0x1 LB: > { %s514_s19 = sadd.s32 4294967295, %s551_s18   ;;  %p518_p0 = scmp.ge.s32.totalorder %s551_s18, 1  ;;  %s551_s18 = sphi %s585_s18, %s15_s18  }
   0x2   : > { %p188_p1 = scmp.lt.s32.totalorder %s551_s18, 5 }
   0x4   : > { %p189_p2 = pnand %p518_p0, %p188_p1 }
   0x5   : > { %s519_s20 = sshll.u32 (!%p189_p2), %s514_s19, 1 }
   0x6   : > { %192 = sbr.rel (%p189_p2) target bundleno = 437 (0x1b5), region = 40  ;;  %p217_p3 = scmp.lt.s32.totalorder (!%p189_p2), %s519_s20, 7 }
   0xb   : > { %v553_v0 = vmov 0.0   ;;  %v234_v1 = vld [vmem:[%s638_s2 + $0x8] sm:$0xff]  ;;  %v554_v2 = vmov 0   ;;  %v236_v3 = vld [vmem:[%s638_s2 + $0x18] sm:$0xff]  ;;  %s643_s20 = smov (!%p217_p3, %s519_s20), 7  ;;  %v233_v4 = vld [vmem:[%s638_s2] sm:$0xff] }
   0xc   : > { %341 = vmatprep.mubr.f32.mxu0 %v553_v0  ;;  %449 = vmatprep.mubr.f32.mxu1 %v553_v0  ;;  %v235_v5 = vld [vmem:[%s638_s2 + $0x10] sm:$0xff]  ;;  %s520_s29 = sshll.u32 %s643_s20, 2  ;;  %vm272_vm0 = vcmask 1043456   ;;  %v375_v8 = vld [vmem:[%s640_s4] sm:$0xff]  ;;  %vm259_vm1 = vcmask 31744   ;;  %v229_v10 = vld [vmem:[%s637_s1 + $0x8] sm:$0xff] }
   0xd   : > { %543 = vset.pattern.permute.xlu1 %v554_v2  ;;  %542 = vset.pattern.permute.xlu0 %v554_v2  ;;  %s220_s7 = scalar_lea.vmem %s636_s0, %s520_s29  ;;  %v228_v9 = vld [vmem:[%s637_s1] sm:$0xff]  ;;  %v230_v11 = vld [vmem:[%s637_s1 + $0x10] sm:$0xff]  ;;  %v231_v12 = vld [vmem:[%s637_s1 + $0x18] sm:$0xff]  ;;  %vm381_vm2 = vcmask 261120   ;;  %s522_s22 = sshll.u32 %s643_s20, 3 }
   0xe   : > { %244 = vperm.xlu1 %543, %v234_v1   ;;  %254 = vperm.xlu0 %542, %v236_v3   ;;  %v232_v6 = vld [vmem:[%s220_s7] sm:$0xff]  ;;  %s226_s25 = scalar_lea.vmem %s641_s5, %s522_s22 }
   0xf   : > { %v258_v7 = vcombine.high %v232_v6, %v232_v6  ;;  %v374_v41 = vld [vmem:[%s639_s3] sm:$0xff] }
  0x11   : > { %523 = vmatprep.subr.msk.mxu0 %vm272_vm0, %v258_v7 }
  0x12   : > { %239 = vperm.xlu1 %543, %v233_v4   ;;  %249 = vperm.xlu0 %542, %v235_v5  }
  0x13   : > { %524 = vmatpush1.msk.msra.mxu0 %vm272_vm0, %v232_v6 }
  0x14   : > { %525 = vmatmul.mubr.msk.f32.vlgmr.msra.gmra.mxu0 %vm259_vm1, %v228_v9 }
  0x15   : > { %347 = vmatprep.mubr.f32.mxu0 %v553_v0 }
  0x16   : > { %378 = vperm.xlu0 %542, %v375_v8  }
  0x18   : > { %526 = vmatmul.mubr.msk.f32.gmra.mxu0 %vm259_vm1, %v229_v10 }
  0x19   : > { %353 = vmatprep.mubr.f32.mxu0 %v553_v0 }
  0x1c   : > { %527 = vmatmul.mubr.msk.f32.gmra.mxu0 %vm259_vm1, %v230_v11 }
  0x1d   : > { %359 = vmatprep.mubr.f32.mxu0 %v553_v0 }
  0x20   : > { %528 = vmatmul.mubr.msk.f32.gmra.mxu0 %vm259_vm1, %v231_v12 }
  0x89   : > { %v255_v17 = vpop.permute.xlu0 %254  ;;  %v245_v20 = vpop.permute.xlu1 %244 }
  0x8d   : > { %v250_v22 = vpop.permute.xlu0 %249  ;;  %v240_v28 = vpop.permute.xlu1 %239 }
  0x91   : > { %v379_v42 = vpop.permute.xlu0 %378 }
  0xd4   : > { %v343_v13 = vpop.f32.mrf.mxu0 }
  0xd5   : > { %v344_v35 = vadd.f32 %v343_v13, %v240_v28 }
  0xd6   : > { %v345_v14 = vpop.f32.mrf.mxu0 }
  0xd7   : > { %v346_v33 = vadd.f32 %v345_v14, %v240_v28  ;;  %v366_v40 = vmax.f32 %v344_v35, 0.0 }
  0xd8   : > { %v349_v15 = vpop.f32.mrf.mxu0 }
  0xd9   : > { %v350_v31 = vadd.f32 %v349_v15, %v245_v20  ;;  %v367_v39 = vmax.f32 %v346_v33, 0.0 }
  0xda   : > { %v351_v16 = vpop.f32.mrf.mxu0 }
  0xdb   : > { %v352_v29 = vadd.f32 %v351_v16, %v245_v20  ;;  %v368_v38 = vmax.f32 %v350_v31, 0.0 }
  0xdc   : > { %v355_v18 = vpop.f32.mrf.mxu0 }
  0xdd   : > { %v356_v27 = vadd.f32 %v355_v18, %v250_v22  ;;  %v369_v37 = vmax.f32 %v352_v29, 0.0 }
  0xde   : > { %v357_v19 = vpop.f32.mrf.mxu0 }
  0xdf   : > { %v358_v25 = vadd.f32 %v357_v19, %v250_v22  ;;  %v370_v36 = vmax.f32 %v356_v27, 0.0 }
  0xe0   : > { %v361_v21 = vpop.f32.mrf.mxu0 }
  0xe1   : > { %v362_v23 = vadd.f32 %v361_v21, %v255_v17  ;;  %v371_v34 = vmax.f32 %v358_v25, 0.0 }
  0xe2   : > { %v363_v24 = vpop.f32.mrf.mxu0 }
  0xe3   : > { %v364_v26 = vadd.f32 %v363_v24, %v255_v17  ;;  %v372_v32 = vmax.f32 %v362_v23, 0.0 }
  0xe5   : > { %v373_v30 = vmax.f32 %v364_v26, 0.0 }
  0xe7   : > { %409 = vmatprep.subr.mxu1 %v373_v30 }
  0xe8   : > { %410 = vmatpush1.msra.mxu1 %v372_v32 }
  0xe9   : > { %411 = vmatprep.subr.mxu1 %v371_v34 }
  0xea   : > { %412 = vmatpush1.msra.mxu1 %v370_v36 }
  0xeb   : > { %413 = vmatprep.subr.mxu1 %v369_v37 }
  0xec   : > { %414 = vmatpush1.msra.mxu1 %v368_v38 }
  0xed   : > { %415 = vmatprep.subr.mxu1 %v367_v39 }
  0xee   : > { %416 = vmatpush1.msra.mxu1 %v366_v40 }
  0xef   : > { %529 = vmatmul.mubr.msk.f32.vlgmr.msra.gmra.mxu1 %vm381_vm2, %v374_v41 }
 0x1af   : > { %v451_v43 = vpop.f32.mrf.mxu1 }
 0x1b0   : > { %v452_v44 = vadd.f32 %v451_v43, %v379_v42 }
 0x1b1   : > { %v453_v45 = vpop.f32.mrf.mxu1 }
 0x1b2   : > { %456 = vst [vmem:[%s226_s25] sm:$0xff] %v452_v44  ;;  %v454_v46 = vadd.f32 %v453_v45, %v379_v42 }
 0x1b4   : > { %457 = vst [vmem:[%s226_s25 + $0x8] sm:$0xff] %v454_v46 }
 0x1b5 PF: > { %s15_s18 = sadd.s32 1, %s551_s18  }
 0x1b6   : > { %p12_p4 = scmp.ge.s32.totalorder %s15_s18, 6  }
 0x1b8   :  { %14 = sbr.rel (!%p12_p4) target bundleno = 1 (0x1), region = 70 }

</bundles_post_ra>
